<compile_context>
chip_gen: v5e
topology: v5e:2x2
jax: 0.10.0
libtpu: 0.0.40
codegen_flags: <defaults>
</compile_context>

<pallas_src>
import functools
import math

import jax
import jax.numpy as jnp
from jax.experimental import pallas as pl
from jax.experimental.pallas import tpu as pltpu


# ------------------------------- kernel ------------------------------------

def _pe_add_kernel(x_ref, pe_ref, o_ref):
    # x_ref/o_ref: (TB, TL); pe_ref: (1, TL), broadcast over the TB rows.
    o_ref[...] = x_ref[...] + pe_ref[...]
    # TODO(synk): nn.Dropout is identity in eval mode; training-mode dropout
    # would fuse here via pltpu.prng_seed + pltpu.stateful_bernoulli.


# ---------------------------- tiling helpers --------------------------------

def _round_up(x, m):
    return -(-x // m) * m


def _pick_lane_tile(sd, target=2048):
    """Largest lane tile <= ~target that divides S*D and is a multiple of 128."""
    if sd % 128 != 0:
        return sd                      # must present the full lane extent
    tl = sd
    while tl > target and tl % 2 == 0 and (tl // 2) % 128 == 0:
        tl //= 2
    return tl


def _pick_row_tile(b, tl, itemsize, budget_bytes=4 << 20):
    """Rows per block: multiple of 8, block <= ~4 MiB so double-buffered
    in+out blocks stay well below v7x's 32 MiB scoped VMEM."""
    rows = max(8, (budget_bytes // (tl * itemsize)) // 8 * 8)
    rows = min(rows, 512)
    return int(min(_round_up(b, 8), rows))


# ------------------------------ wrappers ------------------------------------

def make_pe_table(d_model, max_seq_length=5000):
    """Same formula as the PyTorch module's registered `pe` buffer."""
    assert d_model % 2 == 0, "matches the PyTorch module (even d_model)"
    position = jnp.arange(max_seq_length, dtype=jnp.float32)[:, None]
    div_term = jnp.exp(jnp.arange(0, d_model, 2, dtype=jnp.float32)
                       * (-math.log(10000.0) / d_model))
    pe = jnp.zeros((max_seq_length, d_model), jnp.float32)
    pe = pe.at[:, 0::2].set(jnp.sin(position * div_term))
    pe = pe.at[:, 1::2].set(jnp.cos(position * div_term))
    return pe


def prepare_pe(pe_table, seq_len, d_model, dtype=jnp.float32):
    """Hoisted once per (S, D): the lane-dense (1, S*D) PE row the kernel uses."""
    return pe_table[:seq_len, :d_model].astype(dtype).reshape(1, seq_len * d_model)


@jax.jit
def positional_encoding(x, pe_row):
    """x: (B, S, D); pe_row: (1, S*D) from prepare_pe(). Returns x + pe."""
    B, S, D = x.shape
    SD = S * D
    assert pe_row.shape == (1, SD) and pe_row.dtype == x.dtype

    TL = _pick_lane_tile(SD)                       # lane tile (multiple of 128)
    TB = _pick_row_tile(B, TL, x.dtype.itemsize)   # row tile (multiple of 8)
    Bp = _round_up(B, TB)

    x2 = x.reshape(B, SD)
    if Bp != B:                                    # (8,128)-align partial batch
        x2 = jnp.pad(x2, ((0, Bp - B), (0, 0)))

    # Row axis innermost => PE block index is constant across consecutive
    # steps (no re-DMA of the table); both axes are independent => parallel.
    grid = (SD // TL, Bp // TB)

    out = pl.pallas_call(
        _pe_add_kernel,
        grid=grid,
        in_specs=[
            pl.BlockSpec((TB, TL), lambda l, b: (b, l)),
            pl.BlockSpec((1, TL), lambda l, b: (0, l)),
        ],
        out_specs=pl.BlockSpec((TB, TL), lambda l, b: (b, l)),
        out_shape=jax.ShapeDtypeStruct((Bp, SD), x.dtype),
        input_output_aliases={0: 0},               # pure read-modify-write of x2
        compiler_params=pltpu.CompilerParams(
            dimension_semantics=("parallel", "parallel")),
    )(x2, pe_row)
    return out[:B].reshape(B, S, D)


# --------------------------------- main --------------------------------------

if __name__ == "__main__":
    # Shapes implied by the module's forward: (batch, seq, d_model).
    B, S, D = 2, 8, 32
    MAX_SEQ = 64

    key = jax.random.PRNGKey(0)
    x = jax.random.normal(key, (B, S, D), jnp.float32)

    pe_table = make_pe_table(D, MAX_SEQ)
    pe_row = prepare_pe(pe_table, S, D, x.dtype)

    out = jax.block_until_ready(positional_encoding(x, pe_row))
    ref = x + pe_table[:S][None, :, :]
    assert out.shape == (B, S, D)
    assert bool(jnp.all(jnp.isfinite(out)))
    assert bool(jnp.allclose(out, ref, atol=1e-6, rtol=1e-6))

    # Also exercise the multi-tile, pipelined path (lane-tiled grid of 16 steps).
    B2, S2, D2 = 16, 128, 256
    x_big = jax.random.normal(jax.random.PRNGKey(0), (B2, S2, D2), jnp.float32)
    pe_table2 = make_pe_table(D2, S2)
    pe_row2 = prepare_pe(pe_table2, S2, D2, x_big.dtype)
    out_big = jax.block_until_ready(positional_encoding(x_big, pe_row2))
    ref_big = x_big + pe_table2[:S2][None, :, :]
    assert bool(jnp.allclose(out_big, ref_big, atol=1e-6, rtol=1e-6))

    print("KERNEL_OK")
</pallas_src>

<mosaic_0001>
module attributes {stable_mosaic.version = 11 : i64} {
  func.func @_pe_add_kernel(%arg0: i32, %arg1: i32, %arg2: memref<8x256xf32, #tpu.memory_space<vmem>>, %arg3: memref<1x256xf32, #tpu.memory_space<vmem>>, %arg4: memref<8x256xf32, #tpu.memory_space<vmem>>) attributes {dimension_semantics = [#tpu.dimension_semantics<parallel>, #tpu.dimension_semantics<parallel>], iteration_bounds = array<i64: 1, 1>, scalar_prefetch = 0 : i64, scratch_operands = 0 : i64, tpu.core_type = #tpu.core_type<tc>, window_params = [{transform_indices = @transform_0, window_bounds = array<i64: 8, 256>}, {transform_indices = @transform_1, window_bounds = array<i64: 1, 256>}, {transform_indices = @transform_2, window_bounds = array<i64: 8, 256>}]} {
    %c0 = arith.constant 0 : index
    %c0_0 = arith.constant 0 : index
    %0 = vector.load %arg2[%c0, %c0_0] : memref<8x256xf32, #tpu.memory_space<vmem>>, vector<8x256xf32>
    %c0_1 = arith.constant 0 : index
    %c0_2 = arith.constant 0 : index
    %1 = vector.load %arg3[%c0_1, %c0_2] : memref<1x256xf32, #tpu.memory_space<vmem>>, vector<1x256xf32>
    %2 = vector.broadcast %1 : vector<1x256xf32> to vector<8x256xf32>
    %3 = arith.addf %0, %2 : vector<8x256xf32>
    %c0_3 = arith.constant 0 : index
    %c0_4 = arith.constant 0 : index
    %4 = vector.load %arg4[%c0_3, %c0_4] : memref<8x256xf32, #tpu.memory_space<vmem>>, vector<8x256xf32>
    tpu.vector_store %arg4[%c0_3, %c0_4], %3 {strides = array<i32>} : memref<8x256xf32, #tpu.memory_space<vmem>>, vector<8x256xf32>,
    return
  }
  func.func @transform_0(%arg0: i32, %arg1: i32) -> (i32, i32) {
    %c0_i32 = arith.constant 0 : i32
    return %arg1, %arg0 : i32, i32
  }
  func.func @transform_1(%arg0: i32, %arg1: i32) -> (i32, i32) {
    %c0_i32 = arith.constant 0 : i32
    %c0_i32_0 = arith.constant 0 : i32
    return %c0_i32, %arg0 : i32, i32
  }
  func.func @transform_2(%arg0: i32, %arg1: i32) -> (i32, i32) {
    %c0_i32 = arith.constant 0 : i32
    return %arg1, %arg0 : i32, i32
  }
}

</mosaic_0001>

<bundles_post_ra>
// kernel: positional_encoding.1
= control target key start
LH: loop header
LB: loop body
LE: loop exit
PB: predicated region body
PF: predicated region fallthrough
CT: control target
= control target key end

     0   :  { %s57_s0 = inlined_call_operand.vmem [shape: f32[8,256], index: 0, kind: input, shape index: {}, may-alias: {0,2}]   ;;  %s58_s1 = inlined_call_operand.vmem [shape: f32[1,256], index: 1, kind: input, shape index: {}]   ;;  %s59_s2 = inlined_call_operand.vmem [shape: f32[8,256], index: 2, kind: output, shape index: {}, may-alias: {0,2}]  }
   0x1   :  { %v11_v0 = vld [vmem:[%s57_s0] sm:$0xff]  ;;  %v12_v2 = vld [vmem:[%s57_s0 + $0x8] sm:$0xff] }
   0x2   :  { %v13_v1 = vld [vmem:[%s58_s1] sm:$0x3] }
   0x3   :  { %v15_v3 = vperm.slane %v13_v1, 0  ;;  %v16_v4 = vperm.slane %v13_v1, 1 }
   0x5   :  { %v19_v5 = vadd.f32 %v15_v3, %v11_v0  ;;  %v20_v6 = vadd.f32 %v16_v4, %v12_v2 }
   0x7   :  { %21 = vst [vmem:[%s59_s2] sm:$0xff] %v19_v5 }
   0x8   :  { %22 = vst [vmem:[%s59_s2 + $0x8] sm:$0xff] %v20_v6 }

</bundles_post_ra>
